<compile_context>
chip_gen: v7x
topology: tpu7x:2x2x1
jax: 0.10.0
libtpu: 0.0.40
codegen_flags: <defaults>
</compile_context>

<pallas_src>
import functools

import numpy as np
import jax
import jax.numpy as jnp
from jax import lax
from jax.experimental import pallas as pl
from jax.experimental.pallas import tpu as pltpu

_NEG = -1e30  # finite "minus infinity": keeps 0 * pad = 0 (no NaN) while exp(pad - m) == 0


# ------------------------------- Pallas kernel --------------------------------

def _detr_loss_kernel(logits_ref, onehot_ref, sbox_ref, tbox_ref, bmask_ref, tlen_ref,
                      out_ref, *, num_real, num_classes, eos_coef):
    """Fused DETR loss statistics.

    logits_ref : [B, Q, C_pad]  input dtype (pads hold -1e30); class axis on lanes
    onehot_ref : [B, Q, C_pad]  f32 one-hot of the per-query target class
    sbox_ref   : [4, N_pad]     f32 predicted boxes (cx,cy,w,h on sublanes; query on lanes)
    tbox_ref   : [4, N_pad]     f32 dense per-query target boxes (zeros where unmatched)
    bmask_ref  : [1, N_pad]     f32 1.0 where the query is matched to a GT box
    tlen_ref   : SMEM f32[B]    number of GT boxes per image
    out_ref    : SMEM f32[8] -> [ce_num, ce_den, card_err_sum, correct_sum, matched_sum,
                                 l1_sum, giou_loss_sum, 0]
    """
    B, Q, Cp = logits_ref.shape
    logits = logits_ref[...].astype(jnp.float32)   # bf16 inputs upcast in-kernel
    oh = onehot_ref[...]
    neg = jnp.float32(_NEG)

    # ---- weighted cross-entropy (== F.cross_entropy(..., weight=empty_weight)) ----
    m = jnp.max(logits, axis=-1, keepdims=True)                             # [B,Q,1]
    lse = m + jnp.log(jnp.sum(jnp.exp(logits - m), axis=-1, keepdims=True))
    picked = jnp.sum(logits * oh, axis=-1, keepdims=True)                   # target-class logit
    is_noobj = oh[:, :, num_classes:num_classes + 1]                        # [B,Q,1]
    wt = 1.0 + (jnp.float32(eos_coef) - 1.0) * is_noobj                     # per-query CE weight
    nll = lse - picked
    ce_num = jnp.sum(wt * nll)
    ce_den = jnp.sum(wt)

    # ---- top-1 accuracy over matched queries ----
    matched = 1.0 - is_noobj
    correct = (picked >= m).astype(jnp.float32)   # TODO(synk): exact ties counted as correct
    correct_sum = jnp.sum(matched * correct)
    matched_sum = jnp.sum(matched)

    # ---- cardinality error: #queries whose argmax is not the "no object" class ----
    last = logits[:, :, num_real - 1:num_real]                              # no-object logit
    lane = lax.broadcasted_iota(jnp.int32, (B, Q, Cp), 2)
    max_rest = jnp.max(jnp.where(lane == num_real - 1, neg, logits),
                       axis=-1, keepdims=True)
    not_empty = (max_rest >= last).astype(jnp.float32)                      # [B,Q,1]
    card_pred = jnp.sum(not_empty, axis=1, keepdims=True)                   # [B,1,1]
    biota = lax.broadcasted_iota(jnp.int32, (B, 1, 1), 0)
    card_err = jnp.float32(0.0)
    for b in range(B):  # B is tiny & static
        cp_b = jnp.sum(jnp.where(biota == b, card_pred, 0.0))
        card_err = card_err + jnp.abs(cp_b - tlen_ref[b])

    # ---- box losses: masked dense L1 + GIoU (query index lane-dense) ----
    s = sbox_ref[...]
    t = tbox_ref[...]
    msk = bmask_ref[...]                                                    # [1, N_pad]
    eps = jnp.float32(1e-12)

    scx, scy, sw, sh = s[0:1, :], s[1:2, :], s[2:3, :], s[3:4, :]
    tcx, tcy, tw, th = t[0:1, :], t[1:2, :], t[2:3, :], t[3:4, :]

    l1 = (jnp.abs(scx - tcx) + jnp.abs(scy - tcy)
          + jnp.abs(sw - tw) + jnp.abs(sh - th))
    l1_sum = jnp.sum(msk * l1)

    sx1, sy1, sx2, sy2 = scx - 0.5 * sw, scy - 0.5 * sh, scx + 0.5 * sw, scy + 0.5 * sh
    tx1, ty1, tx2, ty2 = tcx - 0.5 * tw, tcy - 0.5 * th, tcx + 0.5 * tw, tcy + 0.5 * th
    area_s = (sx2 - sx1) * (sy2 - sy1)
    area_t = (tx2 - tx1) * (ty2 - ty1)
    ix1 = jnp.maximum(sx1, tx1)
    iy1 = jnp.maximum(sy1, ty1)
    ix2 = jnp.minimum(sx2, tx2)
    iy2 = jnp.minimum(sy2, ty2)
    inter = jnp.maximum(ix2 - ix1, 0.0) * jnp.maximum(iy2 - iy1, 0.0)
    union = area_s + area_t - inter
    iou = inter / jnp.maximum(union, eps)
    ex1 = jnp.minimum(sx1, tx1)
    ey1 = jnp.minimum(sy1, ty1)
    ex2 = jnp.maximum(sx2, tx2)
    ey2 = jnp.maximum(sy2, ty2)
    area_e = (ex2 - ex1) * (ey2 - ey1)
    giou = iou - (area_e - union) / jnp.maximum(area_e, eps)
    giou_loss_sum = jnp.sum(msk * (1.0 - giou))

    out_ref[0] = ce_num
    out_ref[1] = ce_den
    out_ref[2] = card_err
    out_ref[3] = correct_sum
    out_ref[4] = matched_sum
    out_ref[5] = l1_sum
    out_ref[6] = giou_loss_sum
    out_ref[7] = jnp.float32(0.0)


# ------------------------------ kernel wrapper --------------------------------

@functools.partial(jax.jit, static_argnames=("num_classes", "eos_coef"))
def detr_loss_stats(pred_logits, pred_boxes, target_classes, tgt_boxes_t, box_mask_t,
                    tgt_lens, *, num_classes, eos_coef):
    """Returns f32[8] = [ce_num, ce_den, card_err_sum, correct, matched, l1, giou, 0]."""
    B, Q, C = pred_logits.shape            # C == num_classes + 1
    C_pad = pl.cdiv(C, 128) * 128

    # Lane-dense class axis; pads get a big negative (layout plumbing, fused under jit).
    logits_p = jnp.pad(pred_logits, ((0, 0), (0, 0), (0, C_pad - C)),
                       constant_values=_NEG)
    onehot = jax.nn.one_hot(target_classes, C_pad, dtype=jnp.float32)

    N = B * Q
    Np = tgt_boxes_t.shape[1]
    sbox_t = jnp.zeros((4, Np), jnp.float32).at[:, :N].set(
        jnp.transpose(pred_boxes.astype(jnp.float32), (2, 0, 1)).reshape(4, N))

    kernel = functools.partial(_detr_loss_kernel, num_real=C,
                               num_classes=num_classes, eos_coef=float(eos_coef))
    vmem = pl.BlockSpec(memory_space=pltpu.MemorySpace.VMEM)
    smem = pl.BlockSpec(memory_space=pltpu.MemorySpace.SMEM)
    return pl.pallas_call(
        kernel,
        out_shape=jax.ShapeDtypeStruct((8,), jnp.float32),
        in_specs=[vmem, vmem, vmem, vmem, vmem, smem],
        out_specs=smem,
    )(logits_p, onehot, sbox_t, tgt_boxes_t, box_mask_t, tgt_lens.astype(jnp.float32))


# ------------------------------ host-side glue --------------------------------

def _softmax_np(x):
    x = x - x.max(-1, keepdims=True)
    e = np.exp(x)
    return e / e.sum(-1, keepdims=True)


def _cxcywh_to_xyxy_np(b):
    cx, cy, w, h = b[..., 0], b[..., 1], b[..., 2], b[..., 3]
    return np.stack([cx - 0.5 * w, cy - 0.5 * h, cx + 0.5 * w, cy + 0.5 * h], axis=-1)


def _giou_pairwise_np(a, b):  # a [Q,4], b [T,4] in xyxy
    area_a = (a[:, 2] - a[:, 0]) * (a[:, 3] - a[:, 1])
    area_b = (b[:, 2] - b[:, 0]) * (b[:, 3] - b[:, 1])
    lt = np.maximum(a[:, None, :2], b[None, :, :2])
    rb = np.minimum(a[:, None, 2:], b[None, :, 2:])
    wh = np.clip(rb - lt, 0, None)
    inter = wh[..., 0] * wh[..., 1]
    union = area_a[:, None] + area_b[None, :] - inter
    iou = inter / union
    lt_e = np.minimum(a[:, None, :2], b[None, :, :2])
    rb_e = np.maximum(a[:, None, 2:], b[None, :, 2:])
    wh_e = np.clip(rb_e - lt_e, 0, None)
    area_e = wh_e[..., 0] * wh_e[..., 1]
    return iou - (area_e - union) / area_e


def greedy_matcher(outputs, targets, cost_class=1.0, cost_bbox=5.0, cost_giou=2.0):
    """Deterministic greedy assignment on the DETR matching cost (host-side glue)."""
    logits = np.asarray(outputs['pred_logits'], dtype=np.float64)
    boxes = np.asarray(outputs['pred_boxes'], dtype=np.float64)
    B = logits.shape[0]
    indices = []
    for b in range(B):
        prob = _softmax_np(logits[b])
        tgt_l = np.asarray(targets[b]['labels'])
        tgt_b = np.asarray(targets[b]['boxes'], dtype=np.float64)
        T = tgt_l.shape[0]
        c_cls = -prob[:, tgt_l]
        c_l1 = np.abs(boxes[b][:, None, :] - tgt_b[None, :, :]).sum(-1)
        c_giou = -_giou_pairwise_np(_cxcywh_to_xyxy_np(boxes[b]), _cxcywh_to_xyxy_np(tgt_b))
        C = cost_bbox * c_l1 + cost_class * c_cls + cost_giou * c_giou
        used = np.zeros(C.shape[0], dtype=bool)
        src, tgt = [], []
        for j in range(T):
            col = C[:, j].copy()
            col[used] = np.inf
            i = int(np.argmin(col))
            used[i] = True
            src.append(i)
            tgt.append(j)
        indices.append((np.asarray(src, dtype=np.int64), np.asarray(tgt, dtype=np.int64)))
    return indices


class SetCriterionPallas:
    """JAX/Pallas port of DETR's SetCriterion forward pass (labels/cardinality/boxes)."""

    def __init__(self, num_classes, matcher, weight_dict, eos_coef, losses):
        self.num_classes = num_classes
        self.matcher = matcher
        self.weight_dict = weight_dict
        self.eos_coef = eos_coef
        self.losses = losses
        ew = np.ones(num_classes + 1, dtype=np.float32)
        ew[-1] = eos_coef
        self.empty_weight = jnp.asarray(ew)  # interface parity; kernel uses eos_coef directly

    def __call__(self, outputs, targets):
        return self.forward(outputs, targets)

    def _losses_for(self, outputs, targets, indices, num_boxes, log=True):
        pred_logits = outputs['pred_logits']
        pred_boxes = outputs['pred_boxes']
        B, Q, _ = pred_logits.shape

        # Dense per-query targets built from host-resident `targets`/`indices`.
        # pred_boxes / pred_logits never round-trip to the host for the loss path.
        tc = np.full((B, Q), self.num_classes, dtype=np.int32)
        tbox = np.zeros((B, Q, 4), dtype=np.float32)
        bmask = np.zeros((B, Q), dtype=np.float32)
        tgt_lens = np.zeros((B,), dtype=np.float32)
        for b, (si, ti) in enumerate(indices):
            si = np.asarray(si, dtype=np.int64)
            ti = np.asarray(ti, dtype=np.int64)
            labels_b = np.asarray(targets[b]['labels'])
            boxes_b = np.asarray(targets[b]['boxes'], dtype=np.float32)
            tgt_lens[b] = labels_b.shape[0]
            if si.size:
                tc[b, si] = labels_b[ti]
                tbox[b, si] = boxes_b[ti]
                bmask[b, si] = 1.0

        N = B * Q
        Np = max(128, -(-N // 128) * 128)          # pad query axis to a lane multiple
        tbox_t = np.zeros((4, Np), dtype=np.float32)
        tbox_t[:, :N] = tbox.reshape(N, 4).T
        bmask_t = np.zeros((1, Np), dtype=np.float32)
        bmask_t[0, :N] = bmask.reshape(N)

        stats = detr_loss_stats(
            pred_logits, pred_boxes,
            jnp.asarray(tc), jnp.asarray(tbox_t), jnp.asarray(bmask_t),
            jnp.asarray(tgt_lens),
            num_classes=self.num_classes, eos_coef=float(self.eos_coef))

        losses = {}
        if 'labels' in self.losses:
            losses['loss_ce'] = stats[0] / stats[1]
            if log:
                losses['class_error'] = 100.0 - 100.0 * stats[3] / jnp.maximum(stats[4], 1.0)
        if 'cardinality' in self.losses:
            losses['cardinality_error'] = stats[2] / B
        if 'boxes' in self.losses:
            losses['loss_bbox'] = stats[5] / num_boxes
            losses['loss_giou'] = stats[6] / num_boxes
        return losses

    def forward(self, outputs, targets):
        outputs_without_aux = {k: v for k, v in outputs.items() if k != 'aux_outputs'}
        indices = self.matcher(outputs_without_aux, targets)

        num_boxes = sum(int(np.asarray(t['labels']).shape[0]) for t in targets)
        num_boxes = max(float(num_boxes), 1.0)

        losses = self._losses_for(outputs, targets, indices, num_boxes, log=True)

        if 'aux_outputs' in outputs:
            for i, aux_outputs in enumerate(outputs['aux_outputs']):
                aux_indices = self.matcher(aux_outputs, targets)
                l_dict = self._losses_for(aux_outputs, targets, aux_indices, num_boxes, log=False)
                losses.update({f'{k}_{i}': v for k, v in l_dict.items()})
        return losses


# ------------------------------ reference check -------------------------------

def _reference_losses(pred_logits, pred_boxes, targets, indices, empty_weight, num_classes, num_boxes):
    logits = np.asarray(pred_logits, dtype=np.float64)
    boxes = np.asarray(pred_boxes, dtype=np.float64)
    B, Q, C = logits.shape
    tc = np.full((B, Q), num_classes, dtype=np.int64)
    matched_logits, matched_labels, src_b, tgt_b, tgt_lens = [], [], [], [], []
    for b, (si, ti) in enumerate(indices):
        labels_b = np.asarray(targets[b]['labels'])
        boxes_b = np.asarray(targets[b]['boxes'], dtype=np.float64)
        tc[b, si] = labels_b[ti]
        matched_logits.append(logits[b, si])
        matched_labels.append(labels_b[ti])
        src_b.append(boxes[b, si])
        tgt_b.append(boxes_b[ti])
        tgt_lens.append(labels_b.shape[0])
    ew = np.asarray(empty_weight, dtype=np.float64)
    logp = np.log(_softmax_np(logits))
    w = ew[tc]
    nll = -np.take_along_axis(logp, tc[..., None], axis=-1)[..., 0]
    loss_ce = (w * nll).sum() / w.sum()
    ml = np.concatenate(matched_logits)
    mlab = np.concatenate(matched_labels)
    acc = (ml.argmax(-1) == mlab).astype(np.float64).sum() * 100.0 / mlab.shape[0]
    class_error = 100.0 - acc
    card_pred = (logits.argmax(-1) != C - 1).sum(-1).astype(np.float64)
    card_err = np.abs(card_pred - np.asarray(tgt_lens, dtype=np.float64)).mean()
    sb = np.concatenate(src_b)
    tb = np.concatenate(tgt_b)
    loss_bbox = np.abs(sb - tb).sum() / num_boxes
    g = np.diag(_giou_pairwise_np(_cxcywh_to_xyxy_np(sb), _cxcywh_to_xyxy_np(tb)))
    loss_giou = (1.0 - g).sum() / num_boxes
    return {'loss_ce': loss_ce, 'class_error': class_error, 'cardinality_error': card_err,
            'loss_bbox': loss_bbox, 'loss_giou': loss_giou}


# ----------------------------------- main --------------------------------------

if __name__ == "__main__":
    B, Q, NUM_CLASSES, T = 2, 8, 7, 4         # batch, queries, classes (+1 no-object), GT per image

    key = jax.random.PRNGKey(0)
    k1, k2, k3, k4, k5 = jax.random.split(key, 5)
    pred_logits = jax.random.normal(k1, (B, Q, NUM_CLASSES + 1), dtype=jnp.float32)
    pred_boxes = jax.nn.sigmoid(jax.random.normal(k2, (B, Q, 4), dtype=jnp.float32))
    labels = jax.random.randint(k3, (B, T), 0, NUM_CLASSES, dtype=jnp.int32)
    tb_cxcy = jax.random.uniform(k4, (B, T, 2), minval=0.3, maxval=0.7, dtype=jnp.float32)
    tb_wh = jax.random.uniform(k5, (B, T, 2), minval=0.1, maxval=0.3, dtype=jnp.float32)
    tgt_boxes_all = jnp.concatenate([tb_cxcy, tb_wh], axis=-1)

    outputs = {'pred_logits': pred_logits, 'pred_boxes': pred_boxes}
    targets = [{'labels': labels[b], 'boxes': tgt_boxes_all[b]} for b in range(B)]

    weight_dict = {'loss_ce': 1.0, 'loss_bbox': 5.0, 'loss_giou': 2.0}
    criterion = SetCriterionPallas(NUM_CLASSES, greedy_matcher, weight_dict,
                                   eos_coef=0.1, losses=['labels', 'cardinality', 'boxes'])

    losses = criterion(outputs, targets)
    losses = jax.block_until_ready(losses)

    # numerical check against a pure-numpy reference
    indices = greedy_matcher(outputs, targets)
    ref = _reference_losses(pred_logits, pred_boxes, targets, indices,
                            criterion.empty_weight, NUM_CLASSES, float(B * T))
    for k in ref:
        got = float(np.asarray(losses[k]))
        want = float(ref[k])
        assert np.allclose(got, want, rtol=1e-4, atol=1e-4), (k, got, want)

    print("KERNEL_OK")
</pallas_src>

<mosaic_0001>
module attributes {stable_mosaic.version = 11 : i64} {
  func.func @_detr_loss_kernel(%arg0: memref<2x8x128xf32, #tpu.memory_space<vmem>>, %arg1: memref<2x8x128xf32, #tpu.memory_space<vmem>>, %arg2: memref<4x128xf32, #tpu.memory_space<vmem>>, %arg3: memref<4x128xf32, #tpu.memory_space<vmem>>, %arg4: memref<1x128xf32, #tpu.memory_space<vmem>>, %arg5: memref<2xf32, #tpu.memory_space<smem>>, %arg6: memref<8xf32, #tpu.memory_space<smem>>) attributes {dimension_semantics = [], scalar_prefetch = 0 : i64, scratch_operands = 0 : i64, tpu.core_type = #tpu.core_type<tc>} {
    %c0 = arith.constant 0 : index
    %c0_0 = arith.constant 0 : index
    %c0_1 = arith.constant 0 : index
    %0 = vector.load %arg0[%c0, %c0_0, %c0_1] : memref<2x8x128xf32, #tpu.memory_space<vmem>>, vector<2x8x128xf32>
    %c0_2 = arith.constant 0 : index
    %c0_3 = arith.constant 0 : index
    %c0_4 = arith.constant 0 : index
    %1 = vector.load %arg1[%c0_2, %c0_3, %c0_4] : memref<2x8x128xf32, #tpu.memory_space<vmem>>, vector<2x8x128xf32>
    %cst = arith.constant dense<0xFF800000> : vector<2x8xf32>
    %2 = vector.multi_reduction <maximumf>, %0, %cst [2] : vector<2x8x128xf32> to vector<2x8xf32>
    %3 = vector.shape_cast %2 : vector<2x8xf32> to vector<2x8x1xf32>
    %4 = vector.broadcast %3 : vector<2x8x1xf32> to vector<2x8x128xf32>
    %5 = arith.subf %0, %4 : vector<2x8x128xf32>
    %6 = math.exp %5 : vector<2x8x128xf32>
    %cst_5 = arith.constant dense<0.000000e+00> : vector<2x8xf32>
    %7 = vector.multi_reduction <add>, %6, %cst_5 [2] : vector<2x8x128xf32> to vector<2x8xf32>
    %8 = vector.shape_cast %7 : vector<2x8xf32> to vector<2x8x1xf32>
    %9 = math.log %8 : vector<2x8x1xf32>
    %10 = arith.addf %3, %9 : vector<2x8x1xf32>
    %11 = arith.mulf %0, %1 : vector<2x8x128xf32>
    %cst_6 = arith.constant dense<0.000000e+00> : vector<2x8xf32>
    %12 = vector.multi_reduction <add>, %11, %cst_6 [2] : vector<2x8x128xf32> to vector<2x8xf32>
    %13 = vector.shape_cast %12 : vector<2x8xf32> to vector<2x8x1xf32>
    %14 = vector.extract_strided_slice %1 {offsets = [0, 0, 7], sizes = [2, 8, 1], strides = [1, 1, 1]} : vector<2x8x128xf32> to vector<2x8x1xf32>
    %cst_7 = arith.constant 1.000000e-01 : f32
    %cst_8 = arith.constant 1.000000e+00 : f32
    %15 = arith.subf %cst_7, %cst_8 : f32
    %16 = vector.broadcast %15 : f32 to vector<2x8x1xf32>
    %17 = arith.mulf %16, %14 : vector<2x8x1xf32>
    %cst_9 = arith.constant 1.000000e+00 : f32
    %18 = vector.broadcast %cst_9 : f32 to vector<2x8x1xf32>
    %19 = arith.addf %18, %17 : vector<2x8x1xf32>
    %20 = arith.subf %10, %13 : vector<2x8x1xf32>
    %21 = arith.mulf %19, %20 : vector<2x8x1xf32>
    %22 = vector.shape_cast %21 : vector<2x8x1xf32> to vector<1x2x8x1xf32>
    %cst_10 = arith.constant dense<0.000000e+00> : vector<1xf32>
    %23 = vector.multi_reduction <add>, %22, %cst_10 [1, 2, 3] : vector<1x2x8x1xf32> to vector<1xf32>
    %24 = vector.shape_cast %23 : vector<1xf32> to vector<1x1x1x1xf32>
    %25 = vector.extract %24[0, 0, 0, 0] : f32 from vector<1x1x1x1xf32>
    %26 = vector.shape_cast %19 : vector<2x8x1xf32> to vector<1x2x8x1xf32>
    %cst_11 = arith.constant dense<0.000000e+00> : vector<1xf32>
    %27 = vector.multi_reduction <add>, %26, %cst_11 [1, 2, 3] : vector<1x2x8x1xf32> to vector<1xf32>
    %28 = vector.shape_cast %27 : vector<1xf32> to vector<1x1x1x1xf32>
    %29 = vector.extract %28[0, 0, 0, 0] : f32 from vector<1x1x1x1xf32>
    %cst_12 = arith.constant 1.000000e+00 : f32
    %30 = vector.broadcast %cst_12 : f32 to vector<2x8x1xf32>
    %31 = arith.subf %30, %14 : vector<2x8x1xf32>
    %32 = arith.cmpf oge, %13, %3 : vector<2x8x1xf32>
    %33 = arith.extui %32 : vector<2x8x1xi1> to vector<2x8x1xi32>
    %34 = arith.sitofp %33 : vector<2x8x1xi32> to vector<2x8x1xf32>
    %35 = arith.mulf %31, %34 : vector<2x8x1xf32>
    %36 = vector.shape_cast %35 : vector<2x8x1xf32> to vector<1x2x8x1xf32>
    %cst_13 = arith.constant dense<0.000000e+00> : vector<1xf32>
    %37 = vector.multi_reduction <add>, %36, %cst_13 [1, 2, 3] : vector<1x2x8x1xf32> to vector<1xf32>
    %38 = vector.shape_cast %37 : vector<1xf32> to vector<1x1x1x1xf32>
    %39 = vector.extract %38[0, 0, 0, 0] : f32 from vector<1x1x1x1xf32>
    %40 = vector.shape_cast %31 : vector<2x8x1xf32> to vector<1x2x8x1xf32>
    %cst_14 = arith.constant dense<0.000000e+00> : vector<1xf32>
    %41 = vector.multi_reduction <add>, %40, %cst_14 [1, 2, 3] : vector<1x2x8x1xf32> to vector<1xf32>
    %42 = vector.shape_cast %41 : vector<1xf32> to vector<1x1x1x1xf32>
    %43 = vector.extract %42[0, 0, 0, 0] : f32 from vector<1x1x1x1xf32>
    %44 = vector.extract_strided_slice %0 {offsets = [0, 0, 7], sizes = [2, 8, 1], strides = [1, 1, 1]} : vector<2x8x128xf32> to vector<2x8x1xf32>
    %45 = tpu.iota {dimensions = array<i32: 2>} : vector<2x8x128xi32>
    %c7_i32 = arith.constant 7 : i32
    %46 = vector.broadcast %c7_i32 : i32 to vector<2x8x128xi32>
    %47 = arith.cmpi eq, %45, %46 : vector<2x8x128xi32>
    %cst_15 = arith.constant -1.000000e+30 : f32
    %48 = vector.broadcast %cst_15 : f32 to vector<2x8x128xf32>
    %49 = arith.select %47, %48, %0 : vector<2x8x128xi1>, vector<2x8x128xf32>
    %cst_16 = arith.constant dense<0xFF800000> : vector<2x8xf32>
    %50 = vector.multi_reduction <maximumf>, %49, %cst_16 [2] : vector<2x8x128xf32> to vector<2x8xf32>
    %51 = vector.shape_cast %50 : vector<2x8xf32> to vector<2x8x1xf32>
    %52 = arith.cmpf oge, %51, %44 : vector<2x8x1xf32>
    %53 = arith.extui %52 : vector<2x8x1xi1> to vector<2x8x1xi32>
    %54 = arith.sitofp %53 : vector<2x8x1xi32> to vector<2x8x1xf32>
    %cst_17 = arith.constant dense<0.000000e+00> : vector<2x1xf32>
    %55 = vector.multi_reduction <add>, %54, %cst_17 [1] : vector<2x8x1xf32> to vector<2x1xf32>
    %56 = vector.shape_cast %55 : vector<2x1xf32> to vector<2x1x1xf32>
    %57 = tpu.iota {dimensions = array<i32: 0>} : vector<2x1x1xi32>
    %c0_i32 = arith.constant 0 : i32
    %58 = vector.broadcast %c0_i32 : i32 to vector<2x1x1xi32>
    %59 = arith.cmpi eq, %57, %58 : vector<2x1x1xi32>
    %cst_18 = arith.constant 0.000000e+00 : f32
    %60 = vector.broadcast %cst_18 : f32 to vector<2x1x1xf32>
    %61 = arith.select %59, %56, %60 : vector<2x1x1xi1>, vector<2x1x1xf32>
    %62 = vector.shape_cast %61 : vector<2x1x1xf32> to vector<1x2x1x1xf32>
    %cst_19 = arith.constant dense<0.000000e+00> : vector<1xf32>
    %63 = vector.multi_reduction <add>, %62, %cst_19 [1, 2, 3] : vector<1x2x1x1xf32> to vector<1xf32>
    %64 = vector.shape_cast %63 : vector<1xf32> to vector<1x1x1x1xf32>
    %65 = vector.extract %64[0, 0, 0, 0] : f32 from vector<1x1x1x1xf32>
    %c0_20 = arith.constant 0 : index
    %66 = memref.load %arg5[%c0_20] : memref<2xf32, #tpu.memory_space<smem>>
    %67 = arith.subf %65, %66 : f32
    %68 = math.absf %67 : f32
    %cst_21 = arith.constant 0.000000e+00 : f32
    %69 = arith.addf %cst_21, %68 : f32
    %c1_i32 = arith.constant 1 : i32
    %70 = vector.broadcast %c1_i32 : i32 to vector<2x1x1xi32>
    %71 = arith.cmpi eq, %57, %70 : vector<2x1x1xi32>
    %cst_22 = arith.constant 0.000000e+00 : f32
    %72 = vector.broadcast %cst_22 : f32 to vector<2x1x1xf32>
    %73 = arith.select %71, %56, %72 : vector<2x1x1xi1>, vector<2x1x1xf32>
    %74 = vector.shape_cast %73 : vector<2x1x1xf32> to vector<1x2x1x1xf32>
    %cst_23 = arith.constant dense<0.000000e+00> : vector<1xf32>
    %75 = vector.multi_reduction <add>, %74, %cst_23 [1, 2, 3] : vector<1x2x1x1xf32> to vector<1xf32>
    %76 = vector.shape_cast %75 : vector<1xf32> to vector<1x1x1x1xf32>
    %77 = vector.extract %76[0, 0, 0, 0] : f32 from vector<1x1x1x1xf32>
    %c1 = arith.constant 1 : index
    %78 = memref.load %arg5[%c1] : memref<2xf32, #tpu.memory_space<smem>>
    %79 = arith.subf %77, %78 : f32
    %80 = math.absf %79 : f32
    %81 = arith.addf %69, %80 : f32
    %c0_24 = arith.constant 0 : index
    %c0_25 = arith.constant 0 : index
    %82 = vector.load %arg2[%c0_24, %c0_25] : memref<4x128xf32, #tpu.memory_space<vmem>>, vector<4x128xf32>
    %c0_26 = arith.constant 0 : index
    %c0_27 = arith.constant 0 : index
    %83 = vector.load %arg3[%c0_26, %c0_27] : memref<4x128xf32, #tpu.memory_space<vmem>>, vector<4x128xf32>
    %c0_28 = arith.constant 0 : index
    %c0_29 = arith.constant 0 : index
    %84 = vector.load %arg4[%c0_28, %c0_29] : memref<1x128xf32, #tpu.memory_space<vmem>>, vector<1x128xf32>
    %85 = vector.extract_strided_slice %82 {offsets = [0, 0], sizes = [1, 128], strides = [1, 1]} : vector<4x128xf32> to vector<1x128xf32>
    %86 = vector.extract_strided_slice %82 {offsets = [1, 0], sizes = [1, 128], strides = [1, 1]} : vector<4x128xf32> to vector<1x128xf32>
    %87 = vector.extract_strided_slice %82 {offsets = [2, 0], sizes = [1, 128], strides = [1, 1]} : vector<4x128xf32> to vector<1x128xf32>
    %88 = vector.extract_strided_slice %82 {offsets = [3, 0], sizes = [1, 128], strides = [1, 1]} : vector<4x128xf32> to vector<1x128xf32>
    %89 = vector.extract_strided_slice %83 {offsets = [0, 0], sizes = [1, 128], strides = [1, 1]} : vector<4x128xf32> to vector<1x128xf32>
    %90 = vector.extract_strided_slice %83 {offsets = [1, 0], sizes = [1, 128], strides = [1, 1]} : vector<4x128xf32> to vector<1x128xf32>
    %91 = vector.extract_strided_slice %83 {offsets = [2, 0], sizes = [1, 128], strides = [1, 1]} : vector<4x128xf32> to vector<1x128xf32>
    %92 = vector.extract_strided_slice %83 {offsets = [3, 0], sizes = [1, 128], strides = [1, 1]} : vector<4x128xf32> to vector<1x128xf32>
    %93 = arith.subf %85, %89 : vector<1x128xf32>
    %94 = math.absf %93 : vector<1x128xf32>
    %95 = arith.subf %86, %90 : vector<1x128xf32>
    %96 = math.absf %95 : vector<1x128xf32>
    %97 = arith.addf %94, %96 : vector<1x128xf32>
    %98 = arith.subf %87, %91 : vector<1x128xf32>
    %99 = math.absf %98 : vector<1x128xf32>
    %100 = arith.addf %97, %99 : vector<1x128xf32>
    %101 = arith.subf %88, %92 : vector<1x128xf32>
    %102 = math.absf %101 : vector<1x128xf32>
    %103 = arith.addf %100, %102 : vector<1x128xf32>
    %104 = arith.mulf %84, %103 : vector<1x128xf32>
    %105 = vector.shape_cast %104 : vector<1x128xf32> to vector<1x1x128xf32>
    %cst_30 = arith.constant dense<0.000000e+00> : vector<1xf32>
    %106 = vector.multi_reduction <add>, %105, %cst_30 [1, 2] : vector<1x1x128xf32> to vector<1xf32>
    %107 = vector.shape_cast %106 : vector<1xf32> to vector<1x1x1xf32>
    %108 = vector.extract %107[0, 0, 0] : f32 from vector<1x1x1xf32>
    %cst_31 = arith.constant 5.000000e-01 : f32
    %109 = vector.broadcast %cst_31 : f32 to vector<1x128xf32>
    %110 = arith.mulf %109, %87 : vector<1x128xf32>
    %111 = arith.subf %85, %110 : vector<1x128xf32>
    %cst_32 = arith.constant 5.000000e-01 : f32
    %112 = vector.broadcast %cst_32 : f32 to vector<1x128xf32>
    %113 = arith.mulf %112, %88 : vector<1x128xf32>
    %114 = arith.subf %86, %113 : vector<1x128xf32>
    %cst_33 = arith.constant 5.000000e-01 : f32
    %115 = vector.broadcast %cst_33 : f32 to vector<1x128xf32>
    %116 = arith.mulf %115, %87 : vector<1x128xf32>
    %117 = arith.addf %85, %116 : vector<1x128xf32>
    %cst_34 = arith.constant 5.000000e-01 : f32
    %118 = vector.broadcast %cst_34 : f32 to vector<1x128xf32>
    %119 = arith.mulf %118, %88 : vector<1x128xf32>
    %120 = arith.addf %86, %119 : vector<1x128xf32>
    %cst_35 = arith.constant 5.000000e-01 : f32
    %121 = vector.broadcast %cst_35 : f32 to vector<1x128xf32>
    %122 = arith.mulf %121, %91 : vector<1x128xf32>
    %123 = arith.subf %89, %122 : vector<1x128xf32>
    %cst_36 = arith.constant 5.000000e-01 : f32
    %124 = vector.broadcast %cst_36 : f32 to vector<1x128xf32>
    %125 = arith.mulf %124, %92 : vector<1x128xf32>
    %126 = arith.subf %90, %125 : vector<1x128xf32>
    %cst_37 = arith.constant 5.000000e-01 : f32
    %127 = vector.broadcast %cst_37 : f32 to vector<1x128xf32>
    %128 = arith.mulf %127, %91 : vector<1x128xf32>
    %129 = arith.addf %89, %128 : vector<1x128xf32>
    %cst_38 = arith.constant 5.000000e-01 : f32
    %130 = vector.broadcast %cst_38 : f32 to vector<1x128xf32>
    %131 = arith.mulf %130, %92 : vector<1x128xf32>
    %132 = arith.addf %90, %131 : vector<1x128xf32>
    %133 = arith.subf %117, %111 : vector<1x128xf32>
    %134 = arith.subf %120, %114 : vector<1x128xf32>
    %135 = arith.mulf %133, %134 : vector<1x128xf32>
    %136 = arith.subf %129, %123 : vector<1x128xf32>
    %137 = arith.subf %132, %126 : vector<1x128xf32>
    %138 = arith.mulf %136, %137 : vector<1x128xf32>
    %139 = arith.maximumf %111, %123 : vector<1x128xf32>
    %140 = arith.maximumf %114, %126 : vector<1x128xf32>
    %141 = arith.minimumf %117, %129 : vector<1x128xf32>
    %142 = arith.minimumf %120, %132 : vector<1x128xf32>
    %143 = arith.subf %141, %139 : vector<1x128xf32>
    %cst_39 = arith.constant 0.000000e+00 : f32
    %144 = vector.broadcast %cst_39 : f32 to vector<1x128xf32>
    %145 = arith.maximumf %143, %144 : vector<1x128xf32>
    %146 = arith.subf %142, %140 : vector<1x128xf32>
    %cst_40 = arith.constant 0.000000e+00 : f32
    %147 = vector.broadcast %cst_40 : f32 to vector<1x128xf32>
    %148 = arith.maximumf %146, %147 : vector<1x128xf32>
    %149 = arith.mulf %145, %148 : vector<1x128xf32>
    %150 = arith.addf %135, %138 : vector<1x128xf32>
    %151 = arith.subf %150, %149 : vector<1x128xf32>
    %cst_41 = arith.constant 9.99999996E-13 : f32
    %152 = vector.broadcast %cst_41 : f32 to vector<1x128xf32>
    %153 = arith.maximumf %151, %152 : vector<1x128xf32>
    %154 = arith.divf %149, %153 : vector<1x128xf32>
    %155 = arith.minimumf %111, %123 : vector<1x128xf32>
    %156 = arith.minimumf %114, %126 : vector<1x128xf32>
    %157 = arith.maximumf %117, %129 : vector<1x128xf32>
    %158 = arith.maximumf %120, %132 : vector<1x128xf32>
    %159 = arith.subf %157, %155 : vector<1x128xf32>
    %160 = arith.subf %158, %156 : vector<1x128xf32>
    %161 = arith.mulf %159, %160 : vector<1x128xf32>
    %162 = arith.subf %161, %151 : vector<1x128xf32>
    %cst_42 = arith.constant 9.99999996E-13 : f32
    %163 = vector.broadcast %cst_42 : f32 to vector<1x128xf32>
    %164 = arith.maximumf %161, %163 : vector<1x128xf32>
    %165 = arith.divf %162, %164 : vector<1x128xf32>
    %166 = arith.subf %154, %165 : vector<1x128xf32>
    %cst_43 = arith.constant 1.000000e+00 : f32
    %167 = vector.broadcast %cst_43 : f32 to vector<1x128xf32>
    %168 = arith.subf %167, %166 : vector<1x128xf32>
    %169 = arith.mulf %84, %168 : vector<1x128xf32>
    %170 = vector.shape_cast %169 : vector<1x128xf32> to vector<1x1x128xf32>
    %cst_44 = arith.constant dense<0.000000e+00> : vector<1xf32>
    %171 = vector.multi_reduction <add>, %170, %cst_44 [1, 2] : vector<1x1x128xf32> to vector<1xf32>
    %172 = vector.shape_cast %171 : vector<1xf32> to vector<1x1x1xf32>
    %173 = vector.extract %172[0, 0, 0] : f32 from vector<1x1x1xf32>
    %c0_45 = arith.constant 0 : index
    %174 = memref.load %arg6[%c0_45] : memref<8xf32, #tpu.memory_space<smem>>
    memref.store %25, %arg6[%c0_45] : memref<8xf32, #tpu.memory_space<smem>>
    %c1_46 = arith.constant 1 : index
    %175 = memref.load %arg6[%c1_46] : memref<8xf32, #tpu.memory_space<smem>>
    memref.store %29, %arg6[%c1_46] : memref<8xf32, #tpu.memory_space<smem>>
    %c2 = arith.constant 2 : index
    %176 = memref.load %arg6[%c2] : memref<8xf32, #tpu.memory_space<smem>>
    memref.store %81, %arg6[%c2] : memref<8xf32, #tpu.memory_space<smem>>
    %c3 = arith.constant 3 : index
    %177 = memref.load %arg6[%c3] : memref<8xf32, #tpu.memory_space<smem>>
    memref.store %39, %arg6[%c3] : memref<8xf32, #tpu.memory_space<smem>>
    %c4 = arith.constant 4 : index
    %178 = memref.load %arg6[%c4] : memref<8xf32, #tpu.memory_space<smem>>
    memref.store %43, %arg6[%c4] : memref<8xf32, #tpu.memory_space<smem>>
    %c5 = arith.constant 5 : index
    %179 = memref.load %arg6[%c5] : memref<8xf32, #tpu.memory_space<smem>>
    memref.store %108, %arg6[%c5] : memref<8xf32, #tpu.memory_space<smem>>
    %c6 = arith.constant 6 : index
    %180 = memref.load %arg6[%c6] : memref<8xf32, #tpu.memory_space<smem>>
    memref.store %173, %arg6[%c6] : memref<8xf32, #tpu.memory_space<smem>>
    %cst_47 = arith.constant 0.000000e+00 : f32
    %c7 = arith.constant 7 : index
    %181 = memref.load %arg6[%c7] : memref<8xf32, #tpu.memory_space<smem>>
    memref.store %cst_47, %arg6[%c7] : memref<8xf32, #tpu.memory_space<smem>>
    return
  }
}

</mosaic_0001>

<bundles_post_ra>
// kernel: detr_loss_stats.1
= control target key start
LH: loop header
LB: loop body
LE: loop exit
PB: predicated region body
PF: predicated region fallthrough
CT: control target
= control target key end

     0   :  { %11 = vsyncpa [#allocation4], 0  ;;  %s543_s0 = inlined_call_operand.vmem [shape: f32[2,8,128], index: 0, kind: input, shape index: {}]   ;;  %s544_s1 = inlined_call_operand.vmem [shape: f32[2,8,128], index: 1, kind: input, shape index: {}]   ;;  %s545_s2 = inlined_call_operand.vmem [shape: f32[4,128], index: 2, kind: input, shape index: {}]   ;;  %s546_s3 = inlined_call_operand.vmem [shape: f32[4,128], index: 3, kind: input, shape index: {}]   ;;  %s547_s4 = inlined_call_operand.vmem [shape: f32[1,128], index: 4, kind: input, shape index: {}]   ;;  %s548_s5 = inlined_call_operand.vmem [shape: f32[2], index: 5, kind: input, shape index: {}]   ;;  %s549_s6 = inlined_call_operand.hbm [shape: f32[8], index: 6, kind: output, shape index: {}]  }
   0x1   :  { %12 = vsyncpa [#allocation3], 0  ;;  %s29_s23 = sshll.u32 %s548_s5, 4  ;;  %s30_s23 = int_to_ptr.vmem [resolvable:$true] %s29_s23 }
   0x2   :  { %s408_s24 = scalar_lea.vmem %s30_s23, 16  ;;  %p413_p1 = scmp.lt.s32.totalorder %s30_s23, %s30_s23 }
   0x3   :  { %p409_p0 = scmp.ne.s32.totalorder %s30_s23, %s408_s24  ;;  %p414_p2 = scmp.lt.s32.totalorder %s408_s24, %s408_s24 }
   0x5   :  { %p415_p3 = por %p414_p2, %p413_p1 }
   0x7   :  { %p416_p4 = pnand %p415_p3, %p409_p0 }
   0x9   :  { %419 = shalt.err (!%p416_p4)
}
   0xa   :  { %s434_s25 = smov [#allocation2]  }
   0xb   :  { %32 = dma.vmem_to_smem %s30_s23, 16, %s434_s25, [#allocation4]  }
   0xc   :  { %430 = dma.done.wait [#allocation4], 16  }
   0xd   :  { %431 = vsyncadd [#allocation4], 4294967280 }
   0xe   :  { %36 = sfence }
   0xf   :  { %v37_v0 = vld [vmem:[%s543_s0] sm:$0xff]  ;;  %v166_v1 = vlaneseq  ;;  %v38_v2 = vld [vmem:[%s543_s0 + $0x8] sm:$0xff]  ;;  %v435_v16 = vmov 0.0   ;;  %s436_s0 = smov 121   ;;  %vm181_vm3 = vcmask 64568   ;;  %vm83_vm6 = vcmask 7168  }
  0x10   :  { %41 = vmax.xlane.f32.xlu0 %v37_v0  ;;  %v39_v5 = vld [vmem:[%s544_s1] sm:$0xff]  ;;  %v40_v23 = vld [vmem:[%s544_s1 + $0x8] sm:$0xff]  ;;  %vm206_vm7 = vcmask 0   ;;  %vm265_vm8 = vcmask 1040384   ;;  %s219_s12 = sld [smem:[#allocation2]]  ;;  %s369_s13 = sld [smem:[#allocation2 + $0x1]] }
  0x11   :  { %v167_v3 = vand.u32 127, %v166_v1  ;;  %v61_v6 = vmul.f32 %v39_v5, %v37_v0  ;;  %v116_v14 = vsub.f32 1.0, %v39_v5  ;;  %v62_v25 = vmul.f32 %v40_v23, %v38_v2  ;;  %s420_s28 = scalar_lea.hbm %s549_s6, 16 }
  0x12   :  { %v67_v30 = vmul.f32 -0.9, %v39_v5  ;;  %v68_v32 = vmul.f32 -0.9, %v40_v23  ;;  %v117_v42 = vsub.f32 1.0, %v40_v23  ;;  %p421_p5 = scmp.ne.s32.totalorder %s549_s6, %s420_s28  ;;  %p424_p6 = scmp.lt.u32.totalorder %s420_s28, %s549_s6 }
  0x13   :  { %vm168_vm0 = vcmp.eq.s32.totalorder %v167_v3, 7  ;;  %v250_v3 = vld [vmem:[%s546_s3] sm:$0xf] }
  0x14   :  { %43 = vmax.xlane.f32.xlu0 %v38_v2  ;;  %v169_v4 = vsel %vm168_vm0, -1e+30, %v37_v0  ;;  %v170_v22 = vsel %vm168_vm0, -1e+30, %v38_v2  ;;  %v69_v31 = vadd.f32 1.0, %v67_v30  ;;  %v70_v35 = vadd.f32 1.0, %v68_v32  ;;  %p426_p7 = pnand %p424_p6, %p421_p5 }
  0x15   :  { %v282_v5 = vmul.f32 0.5, %v250_v3 }
  0x18   :  { %171 = vmax.xlane.f32.xlu0 %v169_v4 }
  0x1c   :  { %63 = vadd.xlane.f32.xlu0 %v61_v6 }
  0x9d   :  { %v42_v7 = vpop.xlane.xlu0 %41 }
  0x9e   :  { %v45_v8 = vsub.f32 %v37_v0, %v42_v7 }
  0xa0   :  { %v47_v9 = vmul.f32 1.442695, %v45_v8 }
  0xa1   :  { %v487_v10 = vpop.xlane.xlu0 %43 }
  0xa2   :  { %v46_v11 = vsub.f32 %v38_v2, %v487_v10  ;;  %396 = vpow2.f32 %v47_v9 }
  0xa4   :  { %v49_v12 = vmul.f32 1.442695, %v46_v11 }
  0xa5   :  { %v172_v13 = vpop.xlane.xlu0 %171 }
  0xa6   :  { %398 = vpow2.f32 %v49_v12  ;;  %vm175_vm2 = vcmp.ge.f32.partialorder %v172_v13, %v37_v0 }
  0xa7   :  { %v367_v21 = vsel %vm175_vm2, 1.0, %v435_v16 }
  0xa8   :  { %v182_v24 = vsel %vm181_vm3, %v367_v21, 0.0 }
  0xa9   :  { %v64_v15 = vpop.xlane.xlu0 %63  ;;  %v183_v26 = vrot.slane %v182_v24, 4 }
  0xaa   :  { %vm118_vm1 = vcmp.ge.f32.partialorder %v64_v15, %v42_v7 }
  0xab   :  { %v365_v17 = vsel %vm118_vm1, 1.0, %v435_v16  ;;  %v184_v27 = vadd.f32 %v183_v26, %v182_v24 }
  0xac   :  { %v397_v18 = vpop.eup %396  ;;  %v124_v19 = vmul.f32 %v365_v17, %v116_v14 }
  0xad   :  { %51 = vadd.xlane.f32.xlu1 %v397_v18  ;;  %v185_v28 = vrot.slane %v184_v27, 2 }
  0xae   :  { %128 = vrot.lane.b32.xlu0 %v124_v19, %s436_s0 }
  0xaf   :  { %v186_v29 = vadd.f32 %v185_v28, %v184_v27 }
  0xb0   :  { %v399_v20 = vpop.eup %398 }
  0xb1   :  { %53 = vadd.xlane.f32.xlu1 %v399_v20  ;;  %v187_v33 = vrot.slane %v186_v29, 1 }
  0xb2   :  { %148 = vrot.lane.b32.xlu0 %v116_v14, %s436_s0 }
  0xb3   :  { %v188_v34 = vadd.f32 %v187_v33, %v186_v29 }
  0xb5   :  { %173 = vmax.xlane.f32.xlu1 %v170_v22 }
  0xb6   :  { %200 = vrot.lane.b32.xlu0 %v188_v34, %s436_s0 }
  0xb9   :  { %65 = vadd.xlane.f32.xlu1 %v62_v25 }
  0xca   :  { %98 = vrot.lane.b32.xlu1 %v69_v31, %s436_s0 }
  0xce   :  { %100 = vrot.lane.b32.xlu1 %v70_v35, %s436_s0 }
 0x120   :  { %v129_v33 = vpop.permute.xlu0 %128 }
 0x13a   :  { %v52_v36 = vpop.xlane.xlu1 %51 }
 0x13b   :  { %400 = vlog2.f32 %v52_v36 }
 0x13e   :  { %v54_v37 = vpop.xlane.xlu1 %53 }
 0x13f   :  { %402 = vlog2.f32 %v54_v37 }
 0x142   :  { %v174_v38 = vpop.xlane.xlu1 %173 }
 0x143   :  { %vm176_vm4 = vcmp.ge.f32.partialorder %v174_v38, %v38_v2  ;;  %v249_v2 = vld [vmem:[%s545_s2] sm:$0xf] }
 0x144   :  { %v368_v39 = vsel %vm176_vm4, 1.0, %v435_v16  ;;  %v276_v4 = vmul.f32 0.5, %v249_v2  ;;  %v252_v34 = vsub.f32 %v249_v2, %v250_v3 }
 0x145   :  { %v401_v40 = vpop.eup %400  ;;  %v189_v41 = vsel %vm181_vm3, %v368_v39, 0.0 }
 0x146   :  { %v56_v43 = vmul.f32 0.6931472, %v401_v40  ;;  %v190_v44 = vrot.slane %v189_v41, 4  ;;  %v66_v45 = vpop.xlane.xlu1 %65  ;;  %v278_v6 = vrot.slane %v276_v4, 2  ;;  %v253_v36 = vand.u32 2147483647, %v252_v34 }
 0x147   :  { %vm119_vm5 = vcmp.ge.f32.partialorder %v66_v45, %v487_v10 }
 0x148   :  { %v59_v46 = vadd.f32 %v56_v43, %v42_v7  ;;  %v191_v47 = vadd.f32 %v190_v44, %v189_v41  ;;  %v366_v48 = vsel %vm119_vm5, 1.0, %v435_v16  ;;  %v284_v7 = vrot.slane %v282_v5, 2 }
 0x149   :  { %v403_v49 = vpop.eup %402  ;;  %v125_v50 = vmul.f32 %v366_v48, %v117_v42  ;;  %v280_v8 = vsub.f32 %v249_v2, %v278_v6  ;;  %v281_v9 = vadd.f32 %v278_v6, %v249_v2  ;;  %v255_v37 = vrot.slane %v253_v36, 1 }
 0x14a   :  { %v58_v51 = vmul.f32 0.6931472, %v403_v49  ;;  %v192_v52 = vrot.slane %v191_v47, 2  ;;  %v71_v53 = vsub.f32 %v59_v46, %v64_v15  ;;  %v99_v61 = vpop.permute.xlu1 %98  ;;  %v287_v11 = vadd.f32 %v284_v7, %v250_v3 }
 0x14b   :  { %130 = vrot.lane.b32.xlu1 %v125_v50, %s436_s0  ;;  %v104_v63 = vsel %vm83_vm6, %v99_v61, 0.0  ;;  %v288_v14 = vsub.f32 %v281_v9, %v280_v8  ;;  %v134_v43 = vsel %vm83_vm6, %v129_v33, 0.0  ;;  %v257_v46 = vadd.f32 %v255_v37, %v253_v36 }
 0x14c   :  { %v193_v54 = vadd.f32 %v192_v52, %v191_v47  ;;  %v60_v55 = vadd.f32 %v58_v51, %v487_v10  ;;  %v73_v56 = vmul.f32 %v71_v53, %v69_v31  ;;  %v286_v10 = vsub.f32 %v250_v3, %v284_v7 }
 0x14d   :  { %v299_v13 = vmin.f32 %v281_v9, %v287_v11  ;;  %v290_v17 = vrot.slane %v288_v14, 1  ;;  %v312_v21 = vmax.f32 %v281_v9, %v287_v11  ;;  %v258_v47 = vrot.slane %v253_v36, 2 }
 0x14e   :  { %v72_v57 = vsub.f32 %v60_v55, %v66_v45  ;;  %77 = vrot.lane.b32.xlu0 %v73_v56, %s436_s0  ;;  %v194_v58 = vrot.slane %v193_v54, 1  ;;  %v101_v62 = vpop.permute.xlu1 %100  ;;  %v298_v12 = vmax.f32 %v280_v8, %v286_v10  ;;  %v293_v15 = vsub.f32 %v287_v11, %v286_v10 }
 0x14f   :  { %150 = vrot.lane.b32.xlu1 %v117_v42, %s436_s0  ;;  %v105_v0 = vsel %vm83_vm6, %v101_v62, 0.0  ;;  %v311_v20 = vmin.f32 %v280_v8, %v286_v10  ;;  %v292_v22 = vmul.f32 %v290_v17, %v288_v14  ;;  %v260_v55 = vadd.f32 %v258_v47, %v257_v46 }
 0x150   :  { %v74_v59 = vmul.f32 %v72_v57, %v70_v35  ;;  %v195_v60 = vadd.f32 %v194_v58, %v193_v54  ;;  %v106_v1 = vadd.f32 %v105_v0, %v104_v63  ;;  %v295_v18 = vrot.slane %v293_v15, 1  ;;  %v149_v35 = vpop.permute.xlu0 %148  ;;  %v251_v63 = vld [vmem:[%s547_s4] sm:$0x1]  ;;  %s437_s4 = smov 0.0  }
 0x151   :  { %v313_v25 = vsub.f32 %v312_v21, %v311_v20  ;;  %v154_v51 = vsel %vm83_vm6, %v149_v35, 0.0  ;;  %v261_v56 = vrot.slane %v253_v36, 3  ;;  %350 = sst [smem:[#allocation5 + $0x7]] %s437_s4 }
 0x152   :  { %229 = vrot.lane.b32.xlu0 %v195_v60, %s436_s0  ;;  %v297_v23 = vmul.f32 %v295_v18, %v293_v15 }
 0x153   :  { %79 = vrot.lane.b32.xlu1 %v74_v59, %s436_s0  ;;  %v315_v28 = vrot.slane %v313_v25, 1  ;;  %v263_v62 = vadd.f32 %v261_v56, %v260_v55 }
 0x154   :  { %v306_v27 = vadd.f32 %v297_v23, %v292_v22  ;;  %v201_v41 = vpop.permute.xlu0 %200 }
 0x155   :  { %v317_v30 = vmul.f32 %v315_v28, %v313_v25  ;;  %v207_v5 = vsel %vm206_vm7, %v201_v41, 0.0  ;;  %v264_v6 = vmul.f32 %v263_v62, %v251_v63 }
 0x157   :  { %392 = vrot.lane.b32.xlu1 %v435_v16, %s436_s0  ;;  %v300_v16 = vsub.f32 %v299_v13, %v298_v12  ;;  %v319_v32 = vmax.f32 %v317_v30, 1e-12  ;;  %v266_v13 = vsel %vm265_vm8, %v264_v6, 0.0 }
 0x159   :  { %v301_v19 = vmax.f32 %v300_v16, 0.0 }
 0x15b   :  { %v303_v24 = vrot.slane %v301_v19, 1 }
 0x15d   :  { %v305_v26 = vmul.f32 %v303_v24, %v301_v19 }
 0x15f   :  { %v307_v29 = vsub.f32 %v306_v27, %v305_v26 }
 0x161   :  { %v308_v31 = vmax.f32 %v307_v29, 1e-12  ;;  %v318_v39 = vsub.f32 %v317_v30, %v307_v29 }
 0x163   :  { %404 = vrcp.f32 %v308_v31 }
 0x164   :  { %406 = vrcp.f32 %v319_v32 }
 0x16d   :  { %v405_v38 = vpop.eup %404 }
 0x16e   :  { %v407_v40 = vpop.eup %406  ;;  %v310_v48 = vmul.f32 %v405_v38, %v305_v26 }
 0x16f   :  { %v321_v49 = vmul.f32 %v407_v40, %v318_v39 }
 0x171   :  { %107 = vadd.xlane.f32.xlu0 %v106_v1  ;;  %v322_v57 = vsub.f32 %v310_v48, %v321_v49 }
 0x173   :  { %v323_v0 = vsub.f32 1.0, %v322_v57 }
 0x175   :  { %v324_v10 = vmul.f32 %v323_v0, %v251_v63 }
 0x177   :  { %v325_v14 = vsel %vm265_vm8, %v324_v10, 0.0 }
 0x1bd   :  { %v131_v42 = vpop.permute.xlu1 %130 }
 0x1be   :  { %v135_v44 = vsel %vm83_vm6, %v131_v42, 0.0 }
 0x1bf   :  { %v136_v45 = vadd.f32 %v135_v44, %v134_v43 }
 0x1c0   :  { %v78_v53 = vpop.permute.xlu0 %77 }
 0x1c1   :  { %v151_v50 = vpop.permute.xlu1 %150  ;;  %137 = vadd.xlane.f32.xlu0 %v136_v45  ;;  %v84_v59 = vsel %vm83_vm6, %v78_v53, 0.0 }
 0x1c2   :  { %v155_v52 = vsel %vm83_vm6, %v151_v50, 0.0 }
 0x1c3   :  { %v156_v54 = vadd.f32 %v155_v52, %v154_v51 }
 0x1c4   :  { %v230_v1 = vpop.permute.xlu0 %229 }
 0x1c5   :  { %v80_v58 = vpop.permute.xlu1 %79  ;;  %157 = vadd.xlane.f32.xlu0 %v156_v54  ;;  %v234_v7 = vsel %vm206_vm7, %v230_v1, 0.0 }
 0x1c6   :  { %v85_v60 = vsel %vm83_vm6, %v80_v58, 0.0 }
 0x1c7   :  { %v86_v61 = vadd.f32 %v85_v60, %v84_v59 }
 0x1c9   :  { %v393_v2 = vpop.permute.xlu1 %392  ;;  %87 = vadd.xlane.f32.xlu1 %v86_v61 }
 0x1ca   :  { %v395_v3 = vunpack.i.h.bf16 %v393_v2  ;;  %v394_v4 = vunpack.i.l.bf16 %v393_v2 }
 0x1cc   :  { %v208_v8 = vsel %vm206_vm7, %v394_v4, 0.0  ;;  %v233_v9 = vsel %vm206_vm7, %v395_v3, 0.0 }
 0x1cd   :  { %v209_v11 = vadd.f32 %v208_v8, %v207_v5  ;;  %v235_v12 = vadd.f32 %v234_v7, %v233_v9 }
 0x1cf   :  { %210 = vadd.xlane.f32.xlu1 %v209_v11  ;;  %236 = vadd.xlane.f32.xlu0 %v235_v12 }
 0x1d3   :  { %267 = vadd.xlane.f32.xlu1 %v266_v13  ;;  %326 = vadd.xlane.f32.xlu0 %v325_v14 }
 0x1fe   :  { %v108_v15 = vpop.xlane.xlu0 %107 }
 0x1ff   :  { %v109_v16 = vrot.slane %v108_v15, 4 }
 0x201   :  { %v110_v19 = vadd.f32 %v109_v16, %v108_v15 }
 0x203   :  { %v111_v24 = vrot.slane %v110_v19, 2 }
 0x205   :  { %v112_v30 = vadd.f32 %v111_v24, %v110_v19 }
 0x207   :  { %v113_v39 = vrot.slane %v112_v30, 1 }
 0x209   :  { %v114_v52 = vadd.f32 %v113_v39, %v112_v30 }
 0x24e   :  { %v138_v17 = vpop.xlane.xlu0 %137 }
 0x24f   :  { %v139_v18 = vrot.slane %v138_v17, 4 }
 0x251   :  { %v140_v22 = vadd.f32 %v139_v18, %v138_v17 }
 0x252   :  { %v158_v20 = vpop.xlane.xlu0 %157 }
 0x253   :  { %v159_v21 = vrot.slane %v158_v20, 4  ;;  %v141_v27 = vrot.slane %v140_v22, 2 }
 0x255   :  { %v160_v23 = vadd.f32 %v159_v21, %v158_v20  ;;  %v142_v34 = vadd.f32 %v141_v27, %v140_v22 }
 0x256   :  { %v88_v25 = vpop.xlane.xlu1 %87 }
 0x257   :  { %v89_v26 = vrot.slane %v88_v25, 4  ;;  %v161_v28 = vrot.slane %v160_v23, 2  ;;  %v143_v45 = vrot.slane %v142_v34, 1 }
 0x259   :  { %v90_v29 = vadd.f32 %v89_v26, %v88_v25  ;;  %v162_v35 = vadd.f32 %v161_v28, %v160_v23  ;;  %v144_v57 = vadd.f32 %v143_v45, %v142_v34 }
 0x25b   :  { %v91_v31 = vrot.slane %v90_v29, 2  ;;  %v163_v46 = vrot.slane %v162_v35, 1 }
 0x25c   :  { %v211_v32 = vpop.xlane.xlu1 %210  ;;  %v237_v33 = vpop.xlane.xlu0 %236 }
 0x25d   :  { %v212_v36 = vrot.slane %v211_v32, 4  ;;  %v238_v37 = vrot.slane %v237_v33, 4  ;;  %v92_v38 = vadd.f32 %v91_v31, %v90_v29  ;;  %v164_v58 = vadd.f32 %v163_v46, %v162_v35 }
 0x25f   :  { %v213_v40 = vadd.f32 %v212_v36, %v211_v32  ;;  %v239_v41 = vadd.f32 %v238_v37, %v237_v33  ;;  %v93_v42 = vrot.slane %v92_v38, 1 }
 0x260   :  { %v268_v43 = vpop.xlane.xlu1 %267  ;;  %v327_v44 = vpop.xlane.xlu0 %326 }
 0x261   :  { %v214_v47 = vrot.slane %v213_v40, 2  ;;  %v240_v48 = vrot.slane %v239_v41, 2  ;;  %v269_v49 = vrot.slane %v268_v43, 4  ;;  %v328_v50 = vrot.slane %v327_v44, 4 }
 0x262   :  { %v94_v51 = vadd.f32 %v93_v42, %v92_v38 }
 0x263   :  { %v270_v53 = vadd.f32 %v269_v49, %v268_v43  ;;  %v329_v54 = vadd.f32 %v328_v50, %v327_v44  ;;  %v215_v55 = vadd.f32 %v214_v47, %v213_v40  ;;  %v241_v56 = vadd.f32 %v240_v48, %v239_v41 }
 0x264   :  { %370 = vpush %v94_v51 }
 0x265   :  { %v271_v59 = vrot.slane %v270_v53, 2  ;;  %v330_v60 = vrot.slane %v329_v54, 2  ;;  %372 = vpush %v114_v52  ;;  %v216_v61 = vrot.slane %v215_v55, 1  ;;  %v242_v62 = vrot.slane %v241_v56, 1 }
 0x266   :  { %374 = vpush %v144_v57 }
 0x267   :  { %v272_v63 = vadd.f32 %v271_v59, %v270_v53  ;;  %v331_v0 = vadd.f32 %v330_v60, %v329_v54  ;;  %376 = vpush %v164_v58  ;;  %v217_v1 = vadd.f32 %v216_v61, %v215_v55  ;;  %v243_v2 = vadd.f32 %v242_v62, %v241_v56 }
 0x269   :  { %378 = vpush %v217_v1  ;;  %v273_v3 = vrot.slane %v272_v63, 1  ;;  %v332_v4 = vrot.slane %v331_v0, 1 }
 0x26a   :  { %380 = vpush %v243_v2 }
 0x26b   :  { %v274_v5 = vadd.f32 %v273_v3, %v272_v63  ;;  %v333_v6 = vadd.f32 %v332_v4, %v331_v0 }
 0x26d   :  { %382 = vpush %v274_v5 }
 0x26e   :  { %384 = vpush %v333_v6 }
 0x295   :  { %s371_s14 = spop %370 }
 0x296   :  { %336 = sst [smem:[#allocation5]] %s371_s14  ;;  %s373_s15 = spop %372 }
 0x297   :  { %338 = sst [smem:[#allocation5 + $0x1]] %s373_s15  ;;  %s375_s16 = spop %374 }
 0x298   :  { %342 = sst [smem:[#allocation5 + $0x3]] %s375_s16  ;;  %s377_s17 = spop %376 }
 0x299   :  { %344 = sst [smem:[#allocation5 + $0x4]] %s377_s17 }
 0x29a   :  { %s379_s18 = spop %378 }
 0x29b   :  { %s220_s19 = ssub.f32 %s379_s18, %s219_s12  ;;  %s381_s20 = spop %380 }
 0x29c   :  { %s246_s21 = ssub.f32 %s381_s20, %s369_s13 }
 0x29d   :  { %s221_s22 = sand.u32 2147483647, %s220_s19 }
 0x29e   :  { %s247_s23 = sand.u32 2147483647, %s246_s21  ;;  %s383_s24 = spop %382 }
 0x29f   :  { %s248_s25 = sadd.f32 %s247_s23, %s221_s22  ;;  %s385_s26 = spop %384 }
 0x2a0   :  { %346 = sst [smem:[#allocation5 + $0x5]] %s383_s24 }
 0x2a1   :  { %340 = sst [smem:[#allocation5 + $0x2]] %s248_s25 }
 0x2a2   :  { %348 = sst [smem:[#allocation5 + $0x6]] %s385_s26 }
 0x2a3   :  { %429 = shalt.err (!%p426_p7)
}
 0x2a4   :  { %s438_s8 = smov [#allocation5]  }
 0x2a5   :  { %358 = dma.smem_to_hbm %s438_s8, 16, %s549_s6, [#allocation3]  }
 0x2a6   :  { %432 = dma.done.wait [#allocation3], 16  }
 0x2a7   :  { %433 = vsyncadd [#allocation3], 4294967280 }
 0x2a8   :  { %362 = sfence }
 0x2a9   :  { %363 = vsyncpa [#allocation3], 1 }
 0x2aa   :  { %364 = vsyncpa [#allocation4], 1 }

</bundles_post_ra>
